<compile_context>
chip_gen: v5e
topology: v5e:2x2
jax: 0.10.0
libtpu: 0.0.40
codegen_flags: <defaults>
</compile_context>

<pallas_src>
import jax
import jax.numpy as jnp
from jax import lax
from jax.experimental import pallas as pl
from jax.experimental.pallas import tpu as pltpu

# Fixed Gaussian weights of the module: 1/16 * [[1,2,1],[2,4,2],[1,2,1]].
_GAUSS = ((1.0, 2.0, 1.0),
          (2.0, 4.0, 2.0),
          (1.0, 2.0, 1.0))


def _blur_kernel(x_ref, o_ref):
    # x_ref / o_ref: (Cblk, H, W) block of whole (n, c) planes.
    xb = x_ref[...]
    if xb.dtype != jnp.float32:          # skip the cast when already f32
        xb = xb.astype(jnp.float32)
    cb, h, w = xb.shape

    # ---------- vertical 1-2-1 pass (sublane direction), reflect padding ----
    # up[i] = x[i+1] (reflect at bottom), dn[i] = x[i-1] (reflect at top)
    up = jnp.concatenate([xb[:, 1:, :], xb[:, h - 2:h - 1, :]], axis=1)
    dn = jnp.concatenate([xb[:, 1:2, :], xb[:, :h - 1, :]], axis=1)
    v = (dn + xb) + (xb + up)            # weights 1,2,1 with adds only

    # ---------- horizontal 1-2-1 pass (lane direction), reflect padding -----
    if w % 128 == 0:
        # Lane-dense case: use XLU rolls (free slot) instead of shifted lane
        # slices.  The edge fix-up is written direction-agnostically: at the
        # two border columns both reflected neighbours coincide.
        a = pltpu.roll(v, shift=1, axis=2)
        b = pltpu.roll(v, shift=-1, axis=2)
        s = a + b                                           # v[j-1] + v[j+1] interior
        col = lax.broadcasted_iota(jnp.int32, (cb, h, w), 2)
        s = jnp.where(col == 0, 2.0 * v[:, :, 1:2], s)              # both = col 1
        s = jnp.where(col == w - 1, 2.0 * v[:, :, w - 2:w - 1], s)  # both = col W-2
    else:
        # Narrow-W fallback (fits inside one vreg anyway): shifted lane slices.
        left = jnp.concatenate([v[:, :, 1:2], v[:, :, :w - 1]], axis=2)   # v[j-1]
        right = jnp.concatenate([v[:, :, 1:], v[:, :, w - 2:w - 1]], axis=2)  # v[j+1]
        s = left + right

    out = (s + (v + v)) * (1.0 / 16.0)
    o_ref[...] = out.astype(o_ref.dtype)


def _pick_block_planes(p, plane_bytes, budget_bytes=2 * 1024 * 1024):
    """Largest divisor of p whose input block fits the budget; prefer >=2 grid steps."""
    divs = [d for d in range(1, p + 1)
            if p % d == 0 and d * plane_bytes <= budget_bytes]
    if not divs:
        # TODO(synk): row-strip tiling with a 2-row halo for planes larger than
        # the VMEM budget (needed for very large images, esp. v7x 64 MiB VMEM).
        return 1
    multi = [d for d in divs if p // d >= 2]   # keep both TCs busy on v7x
    return max(multi) if multi else max(divs)


def gaussian_blur(x):
    """x: (N, C, H, W) -> blurred (N, C, H, W); depthwise 3x3, reflect pad."""
    n, c, h, w = x.shape
    assert h >= 2 and w >= 2, "reflect padding requires H >= 2 and W >= 2"
    p = n * c
    x2 = x.reshape(p, h, w)                 # collapses leading dims only (free)
    plane_bytes = h * w * x.dtype.itemsize
    cblk = _pick_block_planes(p, plane_bytes)
    grid = (p // cblk,)

    out2 = pl.pallas_call(
        _blur_kernel,
        out_shape=jax.ShapeDtypeStruct((p, h, w), x.dtype),
        grid=grid,
        in_specs=[pl.BlockSpec((cblk, h, w), lambda i: (i, 0, 0))],
        out_specs=pl.BlockSpec((cblk, h, w), lambda i: (i, 0, 0)),
        compiler_params=pltpu.CompilerParams(
            dimension_semantics=("parallel",),
            vmem_limit_bytes=32 * 1024 * 1024),
    )(x2)
    return out2.reshape(n, c, h, w)


def _reference_blur(x):
    # Pure-JAX reference (matches the PyTorch module exactly).
    xp = jnp.pad(x, ((0, 0), (0, 0), (1, 1), (1, 1)),
                 mode="reflect").astype(jnp.float32)
    n, c, h, w = x.shape
    acc = jnp.zeros((n, c, h, w), jnp.float32)
    for di in range(3):
        for dj in range(3):
            acc = acc + (_GAUSS[di][dj] / 16.0) * xp[:, :, di:di + h, dj:dj + w]
    return acc.astype(x.dtype)


if __name__ == "__main__":
    key = jax.random.PRNGKey(0)
    N, C, H, W = 2, 4, 16, 16
    x = jax.random.normal(key, (N, C, H, W), dtype=jnp.float32)

    out = jax.block_until_ready(gaussian_blur(x))

    ref = _reference_blur(x)
    assert out.shape == (N, C, H, W)
    assert jnp.allclose(out, ref, atol=1e-5, rtol=1e-5)

    print("KERNEL_OK")
</pallas_src>

<mosaic_0001>
module attributes {stable_mosaic.version = 11 : i64} {
  func.func @_blur_kernel(%arg0: i32, %arg1: memref<4x16x16xf32, #tpu.memory_space<vmem>>, %arg2: memref<4x16x16xf32, #tpu.memory_space<vmem>>) attributes {dimension_semantics = [#tpu.dimension_semantics<parallel>], iteration_bounds = array<i64: 2>, scalar_prefetch = 0 : i64, scratch_operands = 0 : i64, tpu.core_type = #tpu.core_type<tc>, window_params = [{transform_indices = @transform_0, window_bounds = array<i64: 4, 16, 16>}, {transform_indices = @transform_1, window_bounds = array<i64: 4, 16, 16>}]} {
    %c0 = arith.constant 0 : index
    %c0_0 = arith.constant 0 : index
    %c0_1 = arith.constant 0 : index
    %0 = vector.load %arg1[%c0, %c0_0, %c0_1] : memref<4x16x16xf32, #tpu.memory_space<vmem>>, vector<4x16x16xf32>
    %1 = vector.extract_strided_slice %0 {offsets = [0, 1, 0], sizes = [4, 15, 16], strides = [1, 1, 1]} : vector<4x16x16xf32> to vector<4x15x16xf32>
    %2 = vector.extract_strided_slice %0 {offsets = [0, 14, 0], sizes = [4, 1, 16], strides = [1, 1, 1]} : vector<4x16x16xf32> to vector<4x1x16xf32>
    %3 = tpu.concatenate %1, %2 in 1 : vector<4x15x16xf32>, vector<4x1x16xf32> -> vector<4x16x16xf32>
    %4 = vector.extract_strided_slice %0 {offsets = [0, 1, 0], sizes = [4, 1, 16], strides = [1, 1, 1]} : vector<4x16x16xf32> to vector<4x1x16xf32>
    %5 = vector.extract_strided_slice %0 {offsets = [0, 0, 0], sizes = [4, 15, 16], strides = [1, 1, 1]} : vector<4x16x16xf32> to vector<4x15x16xf32>
    %6 = tpu.concatenate %4, %5 in 1 : vector<4x1x16xf32>, vector<4x15x16xf32> -> vector<4x16x16xf32>
    %7 = arith.addf %6, %0 : vector<4x16x16xf32>
    %8 = arith.addf %0, %3 : vector<4x16x16xf32>
    %9 = arith.addf %7, %8 : vector<4x16x16xf32>
    %10 = vector.extract_strided_slice %9 {offsets = [0, 0, 1], sizes = [4, 16, 1], strides = [1, 1, 1]} : vector<4x16x16xf32> to vector<4x16x1xf32>
    %11 = vector.extract_strided_slice %9 {offsets = [0, 0, 0], sizes = [4, 16, 15], strides = [1, 1, 1]} : vector<4x16x16xf32> to vector<4x16x15xf32>
    %12 = tpu.concatenate %10, %11 in 2 : vector<4x16x1xf32>, vector<4x16x15xf32> -> vector<4x16x16xf32>
    %13 = vector.extract_strided_slice %9 {offsets = [0, 0, 1], sizes = [4, 16, 15], strides = [1, 1, 1]} : vector<4x16x16xf32> to vector<4x16x15xf32>
    %14 = vector.extract_strided_slice %9 {offsets = [0, 0, 14], sizes = [4, 16, 1], strides = [1, 1, 1]} : vector<4x16x16xf32> to vector<4x16x1xf32>
    %15 = tpu.concatenate %13, %14 in 2 : vector<4x16x15xf32>, vector<4x16x1xf32> -> vector<4x16x16xf32>
    %16 = arith.addf %12, %15 : vector<4x16x16xf32>
    %17 = arith.addf %9, %9 : vector<4x16x16xf32>
    %18 = arith.addf %16, %17 : vector<4x16x16xf32>
    %cst = arith.constant 6.250000e-02 : f32
    %19 = vector.broadcast %cst : f32 to vector<4x16x16xf32>
    %20 = arith.mulf %18, %19 : vector<4x16x16xf32>
    %c0_2 = arith.constant 0 : index
    %c0_3 = arith.constant 0 : index
    %c0_4 = arith.constant 0 : index
    %21 = vector.load %arg2[%c0_2, %c0_3, %c0_4] : memref<4x16x16xf32, #tpu.memory_space<vmem>>, vector<4x16x16xf32>
    tpu.vector_store %arg2[%c0_2, %c0_3, %c0_4], %20 {strides = array<i32>} : memref<4x16x16xf32, #tpu.memory_space<vmem>>, vector<4x16x16xf32>,
    return
  }
  func.func @transform_0(%arg0: i32) -> (i32, i32, i32) {
    %c0_i32 = arith.constant 0 : i32
    %c0_i32_0 = arith.constant 0 : i32
    %c0_i32_1 = arith.constant 0 : i32
    return %arg0, %c0_i32, %c0_i32_0 : i32, i32, i32
  }
  func.func @transform_1(%arg0: i32) -> (i32, i32, i32) {
    %c0_i32 = arith.constant 0 : i32
    %c0_i32_0 = arith.constant 0 : i32
    %c0_i32_1 = arith.constant 0 : i32
    return %arg0, %c0_i32, %c0_i32_0 : i32, i32, i32
  }
}

</mosaic_0001>

<bundles_post_ra>
// kernel: tpu_custom_call.1
= control target key start
LH: loop header
LB: loop body
LE: loop exit
PB: predicated region body
PF: predicated region fallthrough
CT: control target
= control target key end

     0   :  { %6 = vsyncpa [#allocation3], 0  ;;  %s859_s0 = inlined_call_operand.hbm [shape: f32[8,16,16], index: 0, kind: input, shape index: {}]   ;;  %s860_s1 = inlined_call_operand.hbm [shape: f32[8,16,16], index: 1, kind: output, shape index: {}]  }
   0x1   :  { %8 = vsyncpa [#allocation3 + $0x1], 0 }
   0x2   :  { %9 = vsyncpa [#allocation4], 0 }
   0x3   :  { %11 = vsyncpa [#allocation4 + $0x1], 0  ;;  %s629_s6 = smov 0   ;;  %s631_s7 = smov 0  }
   0x4   :  { %s633_s8 = smov 0   ;;  %s635_s9 = smov 0  }
   0x5 LB: > { %s650_s10 = sadd.s32 4294967295, %s611_s9   ;;  %s443_s11 = sadd.s32 4294967294, %s611_s9   ;;  %s611_s9 = sphi %s635_s9, %s870_s9   ;;  %s607_s8 = sphi %s633_s8, %s869_s8   ;;  %s603_s7 = sphi %s631_s7, %s868_s7   ;;  %s599_s6 = sphi %s629_s6, %s867_s6  }
   0x6   : > { %s654_s12 = sadd.s32 1, %s611_s9   ;;  %s24_s13 = sadd.s32 1, %s607_s8 }
   0x7   : > { %s21_s14 = ssub.s32 %s611_s9, %s654_s12  ;;  %p31_p0 = scmp.ne.s32.totalorder %s607_s8, %s603_s7 }
   0x8   : > { %p22_p1 = scmp.eq.s32.totalorder %s21_s14, 0  ;;  %p32_p2 = scmp.eq.s32.totalorder %s611_s9, 0 }
   0x9   : > { %p37_p3 = scmp.ne.s32.totalorder %s603_s7, %s599_s6  ;;  %p38_p4 = scmp.eq.s32.totalorder %s650_s10, 0 }
   0xa   : > { %s666_s15 = scalar_select %p22_p1, %s607_s8, %s24_s13  }
   0xb   : > { %p668_p5 = por %p32_p2, %p31_p0  ;;  %p672_p6 = por %p38_p4, %p37_p3 }
   0xc   : > { %p61_p7 = scmp.eq.s32.totalorder %s650_s10, 1  ;;  %p67_p8 = scmp.eq.s32.totalorder %s443_s11, 1 }
   0xd   : > { %p475_p10 = scmp.lt.s32.totalorder %s611_s9, 2  ;;  %s87_s20 = sand.u32 1, %s607_s8  }
   0xe   : > { %p679_p11 = por %p61_p7, %p31_p0  ;;  %p683_p12 = por %p67_p8, %p37_p3 }
   0xf   : > { %s460_s21 = sshll.u32 %s611_s9, 6  ;;  %s446_s22 = sshll.u32 %s87_s20, 6 }
  0x10   : > { %s97_s25 = scalar_lea.hbm %s859_s0, %s460_s21  ;;  %s91_s27 = scalar_lea.vmem [#allocation2], %s446_s22 }
  0x11   : > { %s98_s26 = sshll.u32 %s97_s25, 4  ;;  %s100_s28 = sshll.u32 %s91_s27, 4  ;;  %s99_s26 = int_to_ptr.hbm [resolvable:$true] %s98_s26  ;;  %s101_s28 = int_to_ptr.vmem [resolvable:$true] %s100_s28 }
  0x12   : > { %p694_p13 = pnand %p475_p10, %p668_p5  ;;  %p450_p0 = scmp.ge.s32.totalorder %s611_s9, 1 }
  0x13   : > { %p108_p1 = scmp.lt.s32.totalorder %s611_s9, 3  ;;  %s88_s30 = scalar_lea.sflag [#allocation3], %s87_s20 }
  0x14   : > { %s515_s2 = sshra.s32 %s99_s26, 4  ;;  %p519_p3 = pneg %p694_p13  ;;  %s516_s2 = int_to_ptr.hbm [resolvable:$true] %s515_s2 }
  0x15   : > { %s517_s3 = scalar_lea.hbm %s516_s2, 64  ;;  %s522_s11 = scalar_lea.hbm %s859_s0, 128 }
  0x16   : > { %p518_p2 = scmp.ne.s32.totalorder %s516_s2, %s517_s3  ;;  %p523_p5 = scmp.lt.s32.totalorder %s516_s2, %s859_s0 }
  0x17   : > { %p524_p8 = scmp.lt.s32.totalorder %s522_s11, %s517_s3 }
  0x18   : > { %p520_p4 = pnand %p519_p3, %p518_p2 }
  0x19   : > { %p525_p10 = por %p524_p8, %p523_p5 }
  0x1a   : > { %p521_p7 = pneg %p520_p4 }
  0x1c   : > { %p526_p9 = pnand %p525_p10, %p521_p7 }
  0x1e   : > { %529 = shalt.err (!%p526_p9)
}
  0x1f   : > { %s613_s16 = smov 128   ;;  %s614_s20 = smov 8  }
  0x20   : > { %470 = dma.hbm_to_vmem [thread:$0]  (!%p694_p13), %s99_s26, 1024, %s101_s28, %s88_s30, %s613_s16, %s613_s16, %s614_s20  }
  0x21   : > { %p109_p2 = pnand %p450_p0, %p108_p1 }
  0x22   : > { %s715_s21 = sand.u32 (!%p109_p2), 1, %s603_s7  }
  0x23   : > { %112 = sbr.rel (%p109_p2) target bundleno = 217 (0xd9), region = 24  ;;  %s451_s22 = sshll.u32 (!%p109_p2), %s715_s21, 6 }
  0x24   : > { %s115_s23 = scalar_lea.sflag (!%p109_p2), [#allocation3], %s715_s21  ;;  %s721_s24 = scalar_lea.vmem (!%p109_p2), [#allocation2], %s451_s22 }
  0x28   : > { %590 = dma.done.wait (%p672_p6), %s115_s23, 1024  }
  0x29   : > { %592 = vsyncadd (%p672_p6), %s115_s23, 4294966272  ;;  %v142_v0 = vld [vmem:[%s721_s24 + $0x10] sm:$0xff]  ;;  %v143_v1 = vld [vmem:[%s721_s24 + $0x18] sm:$0xff]  ;;  %vm156_vm0 = vcmask 1046528   ;;  %vm193_vm1 = vcmask 1040384   ;;  %s615_s17 = smov 127  }
  0x2a   : > { %v140_v2 = vld [vmem:[%s721_s24] sm:$0xff]  ;;  %v160_v3 = vrot.slane %v142_v0, 1  ;;  %v161_v4 = vrot.slane %v143_v1, 1  ;;  %v196_v5 = vrot.slane %v142_v0, 7  ;;  %v141_v6 = vld [vmem:[%s721_s24 + $0x8] sm:$0xff]  ;;  %v178_v17 = vrot.slane %v143_v1, 7 }
  0x2b   : > { %v157_v7 = vrot.slane %v140_v2, 1  ;;  %v144_v8 = vld [vmem:[%s721_s24 + $0x20] sm:$0xff]  ;;  %v158_v9 = vrot.slane %v141_v6, 1  ;;  %v194_v10 = vrot.slane %v140_v2, 7  ;;  %v145_v11 = vld [vmem:[%s721_s24 + $0x28] sm:$0xff]  ;;  %v147_v26 = vld [vmem:[%s721_s24 + $0x38] sm:$0xff] }
  0x2c   : > { %v163_v12 = vrot.slane %v144_v8, 1  ;;  %v198_v13 = vrot.slane %v144_v8, 7  ;;  %v162_v14 = vsel %vm156_vm0, %v160_v3, %v161_v4  ;;  %v211_v15 = vsel %vm193_vm1, %v160_v3, %v196_v5  ;;  %v146_v31 = vld [vmem:[%s721_s24 + $0x30] sm:$0xff]  ;;  %s616_s25 = smov 1   ;;  %s783_s26 = scalar_lea.vmem [#allocation5], %s451_s22 }
  0x2d   : > { %v164_v16 = vrot.slane %v145_v11, 1  ;;  %v216_v18 = vadd.f32 %v211_v15, %v142_v0  ;;  %v224_v19 = vadd.f32 %v162_v14, %v142_v0  ;;  %v159_v20 = vsel %vm156_vm0, %v157_v7, %v158_v9  ;;  %s462_s27 = sshll.u32 %s650_s10, 6  ;;  %s367_s10 = sshll.u32 %s783_s26, 4  ;;  %s368_s10 = int_to_ptr.vmem [resolvable:$true] %s367_s10 }
  0x2e   : > { %v210_v21 = vsel %vm193_vm1, %v157_v7, %v194_v10  ;;  %v222_v23 = vadd.f32 %v159_v20, %v140_v2  ;;  %v212_v25 = vsel %vm193_vm1, %v163_v12, %v198_v13  ;;  %v186_v30 = vsel %vm156_vm0, %v161_v4, %v178_v17  ;;  %s366_s30 = scalar_lea.hbm %s860_s1, %s462_s27  ;;  %s354_s3 = scalar_lea.sflag [#allocation4], %s715_s21 }
  0x2f   : > { %v214_v22 = vadd.f32 %v210_v21, %v140_v2  ;;  %v165_v24 = vsel %vm156_vm0, %v163_v12, %v164_v16  ;;  %v740_v27 = vadd.f32 %v224_v19, %v216_v18  ;;  %v218_v28 = vadd.f32 %v212_v25, %v144_v8  ;;  %s369_s2 = sshll.u32 %s366_s30, 4  ;;  %s565_s14 = scalar_lea.hbm %s860_s1, 128  ;;  %s370_s2 = int_to_ptr.hbm [resolvable:$true] %s369_s2 }
  0x30   : > { %v226_v29 = vadd.f32 %v165_v24, %v144_v8  ;;  %v197_v33 = vsel %vm193_vm1, %v196_v5, %v178_v17  ;;  %v225_v34 = vadd.f32 %v186_v30, %v143_v1  ;;  %v177_v35 = vrot.slane %v141_v6, 7  ;;  %s559_s4 = sshra.s32 %s370_s2, 4  ;;  %s560_s4 = int_to_ptr.hbm [resolvable:$true] %s559_s4 }
  0x31   : > { %v230_v32 = vadd.f32 %v222_v23, %v214_v22  ;;  %250 = vrot.lane.b32.xlu1 %v740_v27, %s615_s17  ;;  %v217_v37 = vadd.f32 %v197_v33, %v143_v1  ;;  %v179_v38 = vrot.slane %v145_v11, 7  ;;  %v167_v39 = vrot.slane %v147_v26, 1  ;;  %s561_s5 = scalar_lea.hbm %s560_s4, 64  ;;  %p566_p0 = scmp.lt.s32.totalorder %s560_s4, %s860_s1 }
  0x32   : > { %v747_v36 = vadd.f32 %v226_v29, %v218_v28  ;;  %v185_v40 = vsel %vm156_vm0, %v158_v9, %v177_v35  ;;  %v195_v41 = vsel %vm193_vm1, %v194_v10, %v177_v35  ;;  %v180_v42 = vrot.slane %v147_v26, 7  ;;  %p562_p6 = scmp.ne.s32.totalorder %s560_s4, %s561_s5  ;;  %p567_p1 = scmp.lt.s32.totalorder %s565_s14, %s561_s5 }
  0x33   : > { %246 = vrot.lane.b32.xlu0 %v230_v32, %s615_s17  ;;  %v200_v43 = vrot.slane %v146_v31, 7  ;;  %v215_v44 = vadd.f32 %v195_v41, %v141_v6  ;;  %v223_v45 = vadd.f32 %v185_v40, %v141_v6  ;;  %v187_v46 = vsel %vm156_vm0, %v164_v16, %v179_v38 }
  0x34   : > { %254 = vrot.lane.b32.xlu2 %v747_v36, %s615_s17  ;;  %v199_v47 = vsel %vm193_vm1, %v198_v13, %v179_v38  ;;  %v227_v48 = vadd.f32 %v187_v46, %v145_v11  ;;  %v233_v49 = vadd.f32 %v225_v34, %v217_v37  ;;  %v188_v52 = vsel %vm156_vm0, %v167_v39, %v180_v42  ;;  %p563_p9 = pnand %p562_p6, %p679_p11  ;;  %p568_p3 = por %p567_p1, %p566_p0 }
  0x35   : > { %v219_v50 = vadd.f32 %v199_v47, %v145_v11  ;;  %v756_v51 = vadd.f32 %v223_v45, %v215_v44  ;;  %v201_v53 = vsel %vm193_vm1, %v200_v43, %v180_v42  ;;  %v166_v54 = vrot.slane %v146_v31, 1 }
  0x36   : > { %v221_v58 = vadd.f32 %v201_v53, %v147_v26  ;;  %v229_v59 = vadd.f32 %v188_v52, %v147_v26  ;;  %vm294_vm2 = vcmask 7168   ;;  %vm303_vm3 = vcmask 121856   ;;  %p564_p13 = pneg %p563_p9 }
  0x37   : > { %v760_v55 = vadd.f32 %v227_v48, %v219_v50  ;;  %v168_v56 = vsel %vm156_vm0, %v166_v54, %v167_v39  ;;  %v213_v57 = vsel %vm193_vm1, %v166_v54, %v200_v43  ;;  %v320_v5 = vadd.f32 %v230_v32, %v230_v32 }
  0x38   : > { %v220_v60 = vadd.f32 %v213_v57, %v146_v31  ;;  %v228_v61 = vadd.f32 %v168_v56, %v146_v31  ;;  %v769_v62 = vadd.f32 %v229_v59, %v221_v58  ;;  %vm344_vm4 = vcmask 130048   ;;  %p569_p4 = pnand %p568_p3, %p564_p13 }
  0x39   : > { %252 = vrot.lane.b32.xlu1 %v233_v49, %s615_s17  ;;  %v323_v13 = vadd.f32 %v233_v49, %v233_v49  ;;  %v322_v31 = vadd.f32 %v740_v27, %v740_v27  ;;  %v321_v34 = vadd.f32 %v756_v51, %v756_v51  ;;  %v325_v44 = vadd.f32 %v760_v55, %v760_v55 }
  0x3a   : > { %v236_v63 = vadd.f32 %v228_v61, %v220_v60  ;;  %v324_v48 = vadd.f32 %v747_v36, %v747_v36 }
  0x3b   : > { %248 = vrot.lane.b32.xlu0 %v756_v51, %s615_s17 }
  0x3c   : > { %256 = vrot.lane.b32.xlu2 %v760_v55, %s615_s17  ;;  %v326_v22 = vadd.f32 %v236_v63, %v236_v63 }
  0x41   : > { %260 = vrot.lane.b32.xlu1 %v769_v62, %s615_s17 }
  0x43   : > { %258 = vrot.lane.b32.xlu0 %v236_v63, %s615_s17 }
  0x44   : > { %270 = vrot.lane.b32.xlu2 %v230_v32, %s616_s25 }
  0x49   : > { %274 = vrot.lane.b32.xlu1 %v740_v27, %s616_s25 }
  0x4b   : > { %272 = vrot.lane.b32.xlu0 %v756_v51, %s616_s25 }
  0x4c   : > { %276 = vrot.lane.b32.xlu2 %v233_v49, %s616_s25 }
  0x51   : > { %280 = vrot.lane.b32.xlu1 %v760_v55, %s616_s25 }
  0x53   : > { %278 = vrot.lane.b32.xlu0 %v747_v36, %s616_s25  ;;  %v327_v36 = vadd.f32 %v769_v62, %v769_v62 }
  0x54   : > { %282 = vrot.lane.b32.xlu2 %v236_v63, %s616_s25 }
  0x5b   : > { %284 = vrot.lane.b32.xlu0 %v769_v62, %s616_s25 }
  0x8e   : > { %v255_v0 = vpop.permute.xlu2 %254 }
  0x96   : > { %v257_v1 = vpop.permute.xlu2 %256 }
  0x9e   : > { %v271_v2 = vpop.permute.xlu2 %270 }
  0xa3   : > { %v251_v3 = vpop.permute.xlu1 %250 }
  0xa5   : > { %v247_v4 = vpop.permute.xlu0 %246 }
  0xa6   : > { %v295_v6 = vsel %vm294_vm2, %v247_v4, %v271_v2  ;;  %v304_v7 = vsel %vm303_vm3, %v247_v4, %v271_v2  ;;  %v277_v10 = vpop.permute.xlu2 %276 }
  0xa7   : > { %v312_v8 = vadd.f32 %v304_v7, %v295_v6 }
  0xa9   : > { %v328_v9 = vadd.f32 %v320_v5, %v312_v8 }
  0xab   : > { %v336_v11 = vmul.f32 0.0625, %v328_v9  ;;  %v253_v12 = vpop.permute.xlu1 %252 }
  0xac   : > { %v298_v14 = vsel %vm294_vm2, %v253_v12, %v277_v10  ;;  %v307_v15 = vsel %vm303_vm3, %v253_v12, %v277_v10 }
  0xad   : > { %345 = vst.msk [vmem:[%s783_s26] sm:$0xff] %vm344_vm4, %v336_v11  ;;  %v249_v16 = vpop.permute.xlu0 %248  ;;  %v315_v17 = vadd.f32 %v307_v15, %v298_v14 }
  0xae   : > { %v283_v20 = vpop.permute.xlu2 %282 }
  0xaf   : > { %v331_v18 = vadd.f32 %v323_v13, %v315_v17 }
  0xb1   : > { %v339_v19 = vmul.f32 0.0625, %v331_v18 }
  0xb3   : > { %348 = vst.msk [vmem:[%s783_s26 + $0x18] sm:$0xff] %vm344_vm4, %v339_v19  ;;  %v261_v21 = vpop.permute.xlu1 %260 }
  0xb5   : > { %v259_v23 = vpop.permute.xlu0 %258 }
  0xb6   : > { %v301_v24 = vsel %vm294_vm2, %v259_v23, %v283_v20  ;;  %v310_v25 = vsel %vm303_vm3, %v259_v23, %v283_v20 }
  0xb7   : > { %v318_v26 = vadd.f32 %v310_v25, %v301_v24 }
  0xb9   : > { %v334_v28 = vadd.f32 %v326_v22, %v318_v26 }
  0xbb   : > { %v342_v29 = vmul.f32 0.0625, %v334_v28  ;;  %v275_v30 = vpop.permute.xlu1 %274 }
  0xbc   : > { %v297_v32 = vsel %vm294_vm2, %v251_v3, %v275_v30  ;;  %v306_v33 = vsel %vm303_vm3, %v251_v3, %v275_v30 }
  0xbd   : > { %351 = vst.msk [vmem:[%s783_s26 + $0x30] sm:$0xff] %vm344_vm4, %v342_v29  ;;  %v273_v35 = vpop.permute.xlu0 %272  ;;  %v314_v37 = vadd.f32 %v306_v33, %v297_v32 }
  0xbe   : > { %v296_v38 = vsel %vm294_vm2, %v249_v16, %v273_v35  ;;  %v305_v39 = vsel %vm303_vm3, %v249_v16, %v273_v35 }
  0xbf   : > { %v313_v40 = vadd.f32 %v305_v39, %v296_v38  ;;  %v330_v41 = vadd.f32 %v322_v31, %v314_v37 }
  0xc1   : > { %v329_v42 = vadd.f32 %v321_v34, %v313_v40  ;;  %v338_v27 = vmul.f32 0.0625, %v330_v41 }
  0xc3   : > { %v337_v43 = vmul.f32 0.0625, %v329_v42  ;;  %347 = vst.msk [vmem:[%s783_s26 + $0x10] sm:$0xff] %vm344_vm4, %v338_v27  ;;  %v281_v45 = vpop.permute.xlu1 %280 }
  0xc4   : > { %v300_v46 = vsel %vm294_vm2, %v257_v1, %v281_v45  ;;  %v309_v47 = vsel %vm303_vm3, %v257_v1, %v281_v45 }
  0xc5   : > { %346 = vst.msk [vmem:[%s783_s26 + $0x8] sm:$0xff] %vm344_vm4, %v337_v43  ;;  %v279_v49 = vpop.permute.xlu0 %278  ;;  %v317_v50 = vadd.f32 %v309_v47, %v300_v46 }
  0xc6   : > { %v299_v51 = vsel %vm294_vm2, %v255_v0, %v279_v49  ;;  %v308_v52 = vsel %vm303_vm3, %v255_v0, %v279_v49 }
  0xc7   : > { %v316_v53 = vadd.f32 %v308_v52, %v299_v51  ;;  %v333_v54 = vadd.f32 %v325_v44, %v317_v50 }
  0xc9   : > { %v332_v55 = vadd.f32 %v324_v48, %v316_v53  ;;  %v341_v56 = vmul.f32 0.0625, %v333_v54 }
  0xcb   : > { %v340_v57 = vmul.f32 0.0625, %v332_v55  ;;  %350 = vst.msk [vmem:[%s783_s26 + $0x28] sm:$0xff] %vm344_vm4, %v341_v56 }
  0xcd   : > { %349 = vst.msk [vmem:[%s783_s26 + $0x20] sm:$0xff] %vm344_vm4, %v340_v57  ;;  %v285_v58 = vpop.permute.xlu0 %284 }
  0xce   : > { %v302_v59 = vsel %vm294_vm2, %v261_v21, %v285_v58  ;;  %v311_v60 = vsel %vm303_vm3, %v261_v21, %v285_v58 }
  0xcf   : > { %v319_v61 = vadd.f32 %v311_v60, %v302_v59 }
  0xd1   : > { %v335_v63 = vadd.f32 %v327_v36, %v319_v61 }
  0xd3   : > { %v343_v0 = vmul.f32 0.0625, %v335_v63 }
  0xd5   : > { %352 = vst.msk [vmem:[%s783_s26 + $0x38] sm:$0xff] %vm344_vm4, %v343_v0 }
  0xd6   : > { %572 = shalt.err (!%p569_p4)
}
  0xd7   : > { %s617_s21 = smov 128   ;;  %s618_s22 = smov 8  }
  0xd8   : > { %465 = dma.vmem_to_hbm [thread:$0]  (%p679_p11), %s368_s10, 1024, %s370_s2, %s354_s3, %s617_s21, %s617_s21, %s618_s22  }
  0xd9 PF: > { %s384_s23 = sand.u32 1, %s599_s6   ;;  %p866_p7 = scmp.ge.s32.totalorder %s611_s9, 2 }
  0xda   : > { %s385_s24 = scalar_lea.sflag [#allocation4], %s384_s23 }
  0xdb   : > { %p472_p5 = pnand %p866_p7, %p683_p12 }
  0xdd   : > { %p473_p8 = pneg %p472_p5 }
  0xdf   : > { %594 = dma.done.wait (%p473_p8), %s385_s24, 1024  }
  0xe0   : > { %596 = vsyncadd (%p473_p8), %s385_s24, 4294966272  ;;  %p14_p10 = scmp.ge.s32.totalorder %s654_s12, 4   ;;  %s867_s6 = smov %s603_s7 }
  0xe1   : > { %s868_s7 = smov %s607_s8  ;;  %s869_s8 = smov %s666_s15 }
  0xe2   : > { %s870_s9 = smov %s654_s12  ;;  %16 = sbr.rel (!%p14_p10) target bundleno = 5 (0x5), region = 69 }
  0xe7   :  { %391 = vsyncpa [#allocation3], 1 }
  0xe8   :  { %393 = vsyncpa [#allocation3 + $0x1], 1 }
  0xe9   :  { %394 = vsyncpa [#allocation4], 1 }
  0xea   :  { %396 = vsyncpa [#allocation4 + $0x1], 1 }

</bundles_post_ra>
